<compile_context>
chip_gen: v5e
topology: v5e:2x2
jax: 0.10.0
libtpu: 0.0.40
codegen_flags: <defaults>
</compile_context>

<pallas_src>
import functools

import jax
import jax.numpy as jnp
from jax import lax
from jax.experimental import pallas as pl
from jax.experimental.pallas import tpu as pltpu


_CHUNK = 16                    # sublanes per inner-loop step (2 f32 vregs / value)
_SUB = _CHUNK * 128            # 2048 points: batch padding granularity
_TB_MAX_SUB = 32               # max chunks per grid step: 32*2048 = 65536 points
                               # -> ~9.5 MiB double-buffered VMEM (ok on v5e/v6e/v7x)
_MIN_SPLIT_SUB = 8             # only force a 2-way megacore split if each half
                               # still has >= 8 chunks (16384 points)


def _num_tensorcores() -> int:
    """Best-effort TensorCore count of device 0 (conservative fallback: 1)."""
    try:
        dev = jax.devices()[0]
        for attr in ("num_cores", "core_count"):
            v = getattr(dev, attr, None)
            if isinstance(v, int) and v > 0:
                return v
        kind = str(getattr(dev, "device_kind", "")).lower()
        if any(t in kind for t in ("v4", "v5p", "v7")):   # dual-TC generations
            return 2
    except Exception:
        pass
    return 1


def _sh_rows(x, y, z, degree):
    """Real SH basis (degree 1..4); coefficients match torch-ngp's CUDA kernel."""
    rows = [jnp.full_like(x, 0.28209479177387814)]                      # l = 0
    if degree > 1:                                                      # l = 1
        rows += [-0.48860251190291987 * y,
                 0.48860251190291987 * z,
                 -0.48860251190291987 * x]
    if degree > 2:                                                      # l = 2
        xy, yz, xz = x * y, y * z, x * z
        x2, y2, z2 = x * x, y * y, z * z
        rows += [1.0925484305920792 * xy,
                 -1.0925484305920792 * yz,
                 0.94617469575755997 * z2 - 0.31539156525251999,
                 -1.0925484305920792 * xz,
                 0.54627421529603959 * x2 - 0.54627421529603959 * y2]
    if degree > 3:                                                      # l = 3
        one_m5z2 = 1.0 - 5.0 * z2                                       # CSE'd
        x2_m_y2 = x2 - y2
        rows += [0.59004358992664352 * y * (-3.0 * x2 + y2),
                 2.8906114426405538 * xy * z,
                 0.45704579946446572 * y * one_m5z2,
                 0.3731763325901154 * z * (5.0 * z2 - 3.0),
                 0.45704579946446572 * x * one_m5z2,
                 1.4453057213202769 * z * x2_m_y2,
                 0.59004358992664352 * x * (-x2 + 3.0 * y2)]
    return rows


def _sh_kernel(inv_ref, x_ref, o_ref, *, degree, n_chunks):
    # inv_ref: (1,) f32 SMEM (= 1/size)
    # x_ref:   (3, TS, 128)          f32 VMEM tile
    # o_ref:   (degree**2, TS, 128)  VMEM tile (f32 or bf16)
    inv = inv_ref[0]
    n_rows = degree ** 2
    out_dtype = o_ref.dtype

    def do_chunk(s):
        sl = pl.ds(s, _CHUNK)
        x = x_ref[0, sl, :] * inv
        y = x_ref[1, sl, :] * inv
        z = x_ref[2, sl, :] * inv
        rows = _sh_rows(x, y, z, degree)
        for r in range(n_rows):
            o_ref[r, sl, :] = rows[r].astype(out_dtype)     # lane-dense stores

    if n_chunks <= 8:
        # small tile: fully static offsets (maximum LLO visibility)
        for c in range(n_chunks):
            do_chunk(c * _CHUNK)
    else:
        def body(c, carry):
            do_chunk(pl.multiple_of(c * _CHUNK, _CHUNK))
            return carry
        lax.fori_loop(0, n_chunks, body, 0, unroll=4)


@functools.partial(jax.jit, static_argnames=("degree", "out_dtype", "channels_first"))
def _sh_encode_flat(flat, size, *, degree, out_dtype, channels_first):
    """flat: (B, 3).  Returns (B, degree**2), or (degree**2, B) if channels_first."""
    B = flat.shape[0]
    out_dim = degree ** 2

    # ---- tile-size selection -------------------------------------------
    num_sub = pl.cdiv(B, _SUB)               # number of 16x128-point chunks
    B_pad = num_sub * _SUB                   # pad only to chunk granularity
    S_total = B_pad // 128

    steps = pl.cdiv(num_sub, _TB_MAX_SUB)    # steps needed at the max tile size
    if steps == 1 and num_sub >= 2 * _MIN_SPLIT_SUB and _num_tensorcores() > 1:
        steps = 2                            # dual-TC chips: give both cores a slab
    tgt_sub = pl.cdiv(num_sub, steps)        # chunks per grid step
    TS = tgt_sub * _CHUNK                    # sublanes per grid step
    grid = pl.cdiv(S_total, TS)              # ragged last block handled by Pallas

    # ---- layout: channels-first, batch on (sublane, lane) --------------
    flat_p = jnp.pad(flat.astype(jnp.float32), ((0, B_pad - B), (0, 0)))
    x_cf = flat_p.T.reshape(3, S_total, 128)

    # 1/size goes into the kernel as an SMEM scalar (no extra HBM pass).
    inv_size = jnp.reshape(1.0 / jnp.asarray(size, jnp.float32), (1,))

    kernel = functools.partial(_sh_kernel, degree=degree, n_chunks=tgt_sub)
    out_cf = pl.pallas_call(
        kernel,
        out_shape=jax.ShapeDtypeStruct((out_dim, S_total, 128), out_dtype),
        grid_spec=pl.GridSpec(
            grid=(grid,),
            in_specs=[
                pl.BlockSpec(memory_space=pltpu.MemorySpace.SMEM),     # inv_size
                pl.BlockSpec((3, TS, 128), lambda i: (0, i, 0)),       # directions
            ],
            out_specs=pl.BlockSpec((out_dim, TS, 128), lambda i: (0, i, 0)),
        ),
        compiler_params=pltpu.CompilerParams(
            dimension_semantics=("parallel",)),
    )(inv_size, x_cf)

    out_cf = out_cf.reshape(out_dim, B_pad)
    if channels_first:
        return out_cf[:, :B]                 # no transpose pass at all
    return out_cf.T[:B]                      # (B, degree**2); fused transpose+slice


class SHEncoder:
    """JAX/Pallas equivalent of the PyTorch SHEncoder module (forward pass, no params).

    __call__(inputs, size=1)                  -> (..., degree**2)   (module semantics)
    __call__(inputs, size=1, channels_first=True)
                                              -> (degree**2, N)     (no output transpose;
                                                 feed directly to a downstream matmul)
    """

    def __init__(self, input_dim=3, degree=4, out_dtype=jnp.float32):
        assert input_dim == 3, "SH encoder only support input dim == 3"
        assert 1 <= degree <= 4, "this Pallas port implements degree in [1, 4]"
        # TODO(synk): degrees 5..8 of the CUDA backend are not ported.
        self.input_dim = input_dim
        self.degree = degree
        self.output_dim = degree ** 2
        self.out_dtype = out_dtype

    def __call__(self, inputs, size=1, channels_first=False):
        inputs = jnp.asarray(inputs)
        prefix_shape = inputs.shape[:-1]
        flat = inputs.reshape(-1, self.input_dim)        # (B, 3)
        out = _sh_encode_flat(flat, size, degree=self.degree,
                              out_dtype=self.out_dtype,
                              channels_first=channels_first)
        if channels_first:
            return out                                    # (degree**2, B_flat)
        return out.reshape(tuple(prefix_shape) + (self.output_dim,))


def _sh_reference(inputs, degree, size=1):
    """Pure-JAX reference for correctness check."""
    v = jnp.asarray(inputs, jnp.float32) / size
    prefix = v.shape[:-1]
    v = v.reshape(-1, 3)
    x, y, z = v[:, 0], v[:, 1], v[:, 2]
    rows = _sh_rows(x, y, z, degree)
    out = jnp.stack(rows, axis=-1)
    return out.reshape(tuple(prefix) + (degree ** 2,))


if __name__ == "__main__":
    key = jax.random.PRNGKey(0)
    # small batch of ray directions: (2, 8, 3)
    dirs = jax.random.normal(key, (2, 8, 3), dtype=jnp.float32)
    dirs = dirs / jnp.linalg.norm(dirs, axis=-1, keepdims=True)

    enc = SHEncoder(input_dim=3, degree=4)
    out = jax.block_until_ready(enc(dirs, size=1))
    ref = _sh_reference(dirs, degree=4, size=1)
    assert out.shape == (2, 8, 16), out.shape
    assert jnp.allclose(out, ref, atol=1e-5, rtol=1e-5), "mismatch vs reference (small)"

    # medium batch: exercises the multi-chunk fori_loop path (and the 2-step
    # megacore split on dual-TensorCore chips)
    big = jax.random.normal(jax.random.PRNGKey(1), (40000, 3), dtype=jnp.float32)
    out_big = jax.block_until_ready(enc(big, size=2.0))
    ref_big = _sh_reference(big, degree=4, size=2.0)
    assert out_big.shape == (40000, 16), out_big.shape
    assert jnp.allclose(out_big, ref_big, atol=1e-5, rtol=1e-5), "mismatch vs reference (big)"

    # channels-first fast path (no output transpose) — same values, transposed
    out_cf = jax.block_until_ready(enc(big, size=2.0, channels_first=True))
    assert out_cf.shape == (16, 40000), out_cf.shape
    assert jnp.allclose(out_cf.T, ref_big, atol=1e-5, rtol=1e-5), "mismatch vs reference (cf)"

    print("KERNEL_OK")
</pallas_src>

<mosaic_0001>
module attributes {stable_mosaic.version = 11 : i64} {
  func.func @_sh_kernel(%arg0: i32, %arg1: memref<1xf32, #tpu.memory_space<smem>>, %arg2: memref<3x16x128xf32, #tpu.memory_space<vmem>>, %arg3: memref<16x16x128xf32, #tpu.memory_space<vmem>>) attributes {dimension_semantics = [#tpu.dimension_semantics<parallel>], iteration_bounds = array<i64: 1>, scalar_prefetch = 0 : i64, scratch_operands = 0 : i64, tpu.core_type = #tpu.core_type<tc>, window_params = [{transform_indices = @transform_0, window_bounds = array<i64: 1>}, {transform_indices = @transform_1, window_bounds = array<i64: 3, 16, 128>}, {transform_indices = @transform_2, window_bounds = array<i64: 16, 16, 128>}]} {
    %c0 = arith.constant 0 : index
    %0 = memref.load %arg1[%c0] : memref<1xf32, #tpu.memory_space<smem>>
    %c0_0 = arith.constant 0 : index
    %c0_1 = arith.constant 0 : index
    %c0_2 = arith.constant 0 : index
    %1 = vector.load %arg2[%c0_0, %c0_1, %c0_2] : memref<3x16x128xf32, #tpu.memory_space<vmem>>, vector<1x16x128xf32>
    %2 = vector.shape_cast %1 : vector<1x16x128xf32> to vector<16x128xf32>
    %3 = vector.broadcast %0 : f32 to vector<16x128xf32>
    %4 = arith.mulf %2, %3 : vector<16x128xf32>
    %c1 = arith.constant 1 : index
    %c0_3 = arith.constant 0 : index
    %c0_4 = arith.constant 0 : index
    %5 = vector.load %arg2[%c1, %c0_3, %c0_4] : memref<3x16x128xf32, #tpu.memory_space<vmem>>, vector<1x16x128xf32>
    %6 = vector.shape_cast %5 : vector<1x16x128xf32> to vector<16x128xf32>
    %7 = vector.broadcast %0 : f32 to vector<16x128xf32>
    %8 = arith.mulf %6, %7 : vector<16x128xf32>
    %c2 = arith.constant 2 : index
    %c0_5 = arith.constant 0 : index
    %c0_6 = arith.constant 0 : index
    %9 = vector.load %arg2[%c2, %c0_5, %c0_6] : memref<3x16x128xf32, #tpu.memory_space<vmem>>, vector<1x16x128xf32>
    %10 = vector.shape_cast %9 : vector<1x16x128xf32> to vector<16x128xf32>
    %11 = vector.broadcast %0 : f32 to vector<16x128xf32>
    %12 = arith.mulf %10, %11 : vector<16x128xf32>
    %cst = arith.constant 0.282094806 : f32
    %13 = vector.broadcast %cst : f32 to vector<16x128xf32>
    %cst_7 = arith.constant -0.488602519 : f32
    %14 = vector.broadcast %cst_7 : f32 to vector<16x128xf32>
    %15 = arith.mulf %14, %8 : vector<16x128xf32>
    %cst_8 = arith.constant 0.488602519 : f32
    %16 = vector.broadcast %cst_8 : f32 to vector<16x128xf32>
    %17 = arith.mulf %16, %12 : vector<16x128xf32>
    %cst_9 = arith.constant -0.488602519 : f32
    %18 = vector.broadcast %cst_9 : f32 to vector<16x128xf32>
    %19 = arith.mulf %18, %4 : vector<16x128xf32>
    %20 = arith.mulf %4, %8 : vector<16x128xf32>
    %21 = arith.mulf %8, %12 : vector<16x128xf32>
    %22 = arith.mulf %4, %12 : vector<16x128xf32>
    %23 = arith.mulf %4, %4 : vector<16x128xf32>
    %24 = arith.mulf %8, %8 : vector<16x128xf32>
    %25 = arith.mulf %12, %12 : vector<16x128xf32>
    %cst_10 = arith.constant 1.09254849 : f32
    %26 = vector.broadcast %cst_10 : f32 to vector<16x128xf32>
    %27 = arith.mulf %26, %20 : vector<16x128xf32>
    %cst_11 = arith.constant -1.09254849 : f32
    %28 = vector.broadcast %cst_11 : f32 to vector<16x128xf32>
    %29 = arith.mulf %28, %21 : vector<16x128xf32>
    %cst_12 = arith.constant 0.946174681 : f32
    %30 = vector.broadcast %cst_12 : f32 to vector<16x128xf32>
    %31 = arith.mulf %30, %25 : vector<16x128xf32>
    %cst_13 = arith.constant 0.31539157 : f32
    %32 = vector.broadcast %cst_13 : f32 to vector<16x128xf32>
    %33 = arith.subf %31, %32 : vector<16x128xf32>
    %cst_14 = arith.constant -1.09254849 : f32
    %34 = vector.broadcast %cst_14 : f32 to vector<16x128xf32>
    %35 = arith.mulf %34, %22 : vector<16x128xf32>
    %cst_15 = arith.constant 0.546274245 : f32
    %36 = vector.broadcast %cst_15 : f32 to vector<16x128xf32>
    %37 = arith.mulf %36, %23 : vector<16x128xf32>
    %cst_16 = arith.constant 0.546274245 : f32
    %38 = vector.broadcast %cst_16 : f32 to vector<16x128xf32>
    %39 = arith.mulf %38, %24 : vector<16x128xf32>
    %40 = arith.subf %37, %39 : vector<16x128xf32>
    %cst_17 = arith.constant 5.000000e+00 : f32
    %41 = vector.broadcast %cst_17 : f32 to vector<16x128xf32>
    %42 = arith.mulf %41, %25 : vector<16x128xf32>
    %cst_18 = arith.constant 1.000000e+00 : f32
    %43 = vector.broadcast %cst_18 : f32 to vector<16x128xf32>
    %44 = arith.subf %43, %42 : vector<16x128xf32>
    %45 = arith.subf %23, %24 : vector<16x128xf32>
    %cst_19 = arith.constant 0.590043604 : f32
    %46 = vector.broadcast %cst_19 : f32 to vector<16x128xf32>
    %47 = arith.mulf %46, %8 : vector<16x128xf32>
    %cst_20 = arith.constant -3.000000e+00 : f32
    %48 = vector.broadcast %cst_20 : f32 to vector<16x128xf32>
    %49 = arith.mulf %48, %23 : vector<16x128xf32>
    %50 = arith.addf %49, %24 : vector<16x128xf32>
    %51 = arith.mulf %47, %50 : vector<16x128xf32>
    %cst_21 = arith.constant 2.89061141 : f32
    %52 = vector.broadcast %cst_21 : f32 to vector<16x128xf32>
    %53 = arith.mulf %52, %20 : vector<16x128xf32>
    %54 = arith.mulf %53, %12 : vector<16x128xf32>
    %cst_22 = arith.constant 0.457045794 : f32
    %55 = vector.broadcast %cst_22 : f32 to vector<16x128xf32>
    %56 = arith.mulf %55, %8 : vector<16x128xf32>
    %57 = arith.mulf %56, %44 : vector<16x128xf32>
    %cst_23 = arith.constant 0.373176336 : f32
    %58 = vector.broadcast %cst_23 : f32 to vector<16x128xf32>
    %59 = arith.mulf %58, %12 : vector<16x128xf32>
    %cst_24 = arith.constant 5.000000e+00 : f32
    %60 = vector.broadcast %cst_24 : f32 to vector<16x128xf32>
    %61 = arith.mulf %60, %25 : vector<16x128xf32>
    %cst_25 = arith.constant 3.000000e+00 : f32
    %62 = vector.broadcast %cst_25 : f32 to vector<16x128xf32>
    %63 = arith.subf %61, %62 : vector<16x128xf32>
    %64 = arith.mulf %59, %63 : vector<16x128xf32>
    %cst_26 = arith.constant 0.457045794 : f32
    %65 = vector.broadcast %cst_26 : f32 to vector<16x128xf32>
    %66 = arith.mulf %65, %4 : vector<16x128xf32>
    %67 = arith.mulf %66, %44 : vector<16x128xf32>
    %cst_27 = arith.constant 1.44530571 : f32
    %68 = vector.broadcast %cst_27 : f32 to vector<16x128xf32>
    %69 = arith.mulf %68, %12 : vector<16x128xf32>
    %70 = arith.mulf %69, %45 : vector<16x128xf32>
    %cst_28 = arith.constant 0.590043604 : f32
    %71 = vector.broadcast %cst_28 : f32 to vector<16x128xf32>
    %72 = arith.mulf %71, %4 : vector<16x128xf32>
    %cst_29 = arith.constant 0.000000e+00 : f32
    %73 = vector.broadcast %cst_29 : f32 to vector<16x128xf32>
    %74 = arith.subf %73, %23 : vector<16x128xf32>
    %cst_30 = arith.constant 3.000000e+00 : f32
    %75 = vector.broadcast %cst_30 : f32 to vector<16x128xf32>
    %76 = arith.mulf %75, %24 : vector<16x128xf32>
    %77 = arith.addf %74, %76 : vector<16x128xf32>
    %78 = arith.mulf %72, %77 : vector<16x128xf32>
    %c0_31 = arith.constant 0 : index
    %c0_32 = arith.constant 0 : index
    %c0_33 = arith.constant 0 : index
    %79 = vector.load %arg3[%c0_31, %c0_32, %c0_33] : memref<16x16x128xf32, #tpu.memory_space<vmem>>, vector<1x16x128xf32>
    %80 = vector.shape_cast %79 : vector<1x16x128xf32> to vector<16x128xf32>
    %81 = vector.shape_cast %13 : vector<16x128xf32> to vector<1x16x128xf32>
    tpu.vector_store %arg3[%c0_31, %c0_32, %c0_33], %81 {strides = array<i32>} : memref<16x16x128xf32, #tpu.memory_space<vmem>>, vector<1x16x128xf32>,
    %c1_34 = arith.constant 1 : index
    %c0_35 = arith.constant 0 : index
    %c0_36 = arith.constant 0 : index
    %82 = vector.load %arg3[%c1_34, %c0_35, %c0_36] : memref<16x16x128xf32, #tpu.memory_space<vmem>>, vector<1x16x128xf32>
    %83 = vector.shape_cast %82 : vector<1x16x128xf32> to vector<16x128xf32>
    %84 = vector.shape_cast %15 : vector<16x128xf32> to vector<1x16x128xf32>
    tpu.vector_store %arg3[%c1_34, %c0_35, %c0_36], %84 {strides = array<i32>} : memref<16x16x128xf32, #tpu.memory_space<vmem>>, vector<1x16x128xf32>,
    %c2_37 = arith.constant 2 : index
    %c0_38 = arith.constant 0 : index
    %c0_39 = arith.constant 0 : index
    %85 = vector.load %arg3[%c2_37, %c0_38, %c0_39] : memref<16x16x128xf32, #tpu.memory_space<vmem>>, vector<1x16x128xf32>
    %86 = vector.shape_cast %85 : vector<1x16x128xf32> to vector<16x128xf32>
    %87 = vector.shape_cast %17 : vector<16x128xf32> to vector<1x16x128xf32>
    tpu.vector_store %arg3[%c2_37, %c0_38, %c0_39], %87 {strides = array<i32>} : memref<16x16x128xf32, #tpu.memory_space<vmem>>, vector<1x16x128xf32>,
    %c3 = arith.constant 3 : index
    %c0_40 = arith.constant 0 : index
    %c0_41 = arith.constant 0 : index
    %88 = vector.load %arg3[%c3, %c0_40, %c0_41] : memref<16x16x128xf32, #tpu.memory_space<vmem>>, vector<1x16x128xf32>
    %89 = vector.shape_cast %88 : vector<1x16x128xf32> to vector<16x128xf32>
    %90 = vector.shape_cast %19 : vector<16x128xf32> to vector<1x16x128xf32>
    tpu.vector_store %arg3[%c3, %c0_40, %c0_41], %90 {strides = array<i32>} : memref<16x16x128xf32, #tpu.memory_space<vmem>>, vector<1x16x128xf32>,
    %c4 = arith.constant 4 : index
    %c0_42 = arith.constant 0 : index
    %c0_43 = arith.constant 0 : index
    %91 = vector.load %arg3[%c4, %c0_42, %c0_43] : memref<16x16x128xf32, #tpu.memory_space<vmem>>, vector<1x16x128xf32>
    %92 = vector.shape_cast %91 : vector<1x16x128xf32> to vector<16x128xf32>
    %93 = vector.shape_cast %27 : vector<16x128xf32> to vector<1x16x128xf32>
    tpu.vector_store %arg3[%c4, %c0_42, %c0_43], %93 {strides = array<i32>} : memref<16x16x128xf32, #tpu.memory_space<vmem>>, vector<1x16x128xf32>,
    %c5 = arith.constant 5 : index
    %c0_44 = arith.constant 0 : index
    %c0_45 = arith.constant 0 : index
    %94 = vector.load %arg3[%c5, %c0_44, %c0_45] : memref<16x16x128xf32, #tpu.memory_space<vmem>>, vector<1x16x128xf32>
    %95 = vector.shape_cast %94 : vector<1x16x128xf32> to vector<16x128xf32>
    %96 = vector.shape_cast %29 : vector<16x128xf32> to vector<1x16x128xf32>
    tpu.vector_store %arg3[%c5, %c0_44, %c0_45], %96 {strides = array<i32>} : memref<16x16x128xf32, #tpu.memory_space<vmem>>, vector<1x16x128xf32>,
    %c6 = arith.constant 6 : index
    %c0_46 = arith.constant 0 : index
    %c0_47 = arith.constant 0 : index
    %97 = vector.load %arg3[%c6, %c0_46, %c0_47] : memref<16x16x128xf32, #tpu.memory_space<vmem>>, vector<1x16x128xf32>
    %98 = vector.shape_cast %97 : vector<1x16x128xf32> to vector<16x128xf32>
    %99 = vector.shape_cast %33 : vector<16x128xf32> to vector<1x16x128xf32>
    tpu.vector_store %arg3[%c6, %c0_46, %c0_47], %99 {strides = array<i32>} : memref<16x16x128xf32, #tpu.memory_space<vmem>>, vector<1x16x128xf32>,
    %c7 = arith.constant 7 : index
    %c0_48 = arith.constant 0 : index
    %c0_49 = arith.constant 0 : index
    %100 = vector.load %arg3[%c7, %c0_48, %c0_49] : memref<16x16x128xf32, #tpu.memory_space<vmem>>, vector<1x16x128xf32>
    %101 = vector.shape_cast %100 : vector<1x16x128xf32> to vector<16x128xf32>
    %102 = vector.shape_cast %35 : vector<16x128xf32> to vector<1x16x128xf32>
    tpu.vector_store %arg3[%c7, %c0_48, %c0_49], %102 {strides = array<i32>} : memref<16x16x128xf32, #tpu.memory_space<vmem>>, vector<1x16x128xf32>,
    %c8 = arith.constant 8 : index
    %c0_50 = arith.constant 0 : index
    %c0_51 = arith.constant 0 : index
    %103 = vector.load %arg3[%c8, %c0_50, %c0_51] : memref<16x16x128xf32, #tpu.memory_space<vmem>>, vector<1x16x128xf32>
    %104 = vector.shape_cast %103 : vector<1x16x128xf32> to vector<16x128xf32>
    %105 = vector.shape_cast %40 : vector<16x128xf32> to vector<1x16x128xf32>
    tpu.vector_store %arg3[%c8, %c0_50, %c0_51], %105 {strides = array<i32>} : memref<16x16x128xf32, #tpu.memory_space<vmem>>, vector<1x16x128xf32>,
    %c9 = arith.constant 9 : index
    %c0_52 = arith.constant 0 : index
    %c0_53 = arith.constant 0 : index
    %106 = vector.load %arg3[%c9, %c0_52, %c0_53] : memref<16x16x128xf32, #tpu.memory_space<vmem>>, vector<1x16x128xf32>
    %107 = vector.shape_cast %106 : vector<1x16x128xf32> to vector<16x128xf32>
    %108 = vector.shape_cast %51 : vector<16x128xf32> to vector<1x16x128xf32>
    tpu.vector_store %arg3[%c9, %c0_52, %c0_53], %108 {strides = array<i32>} : memref<16x16x128xf32, #tpu.memory_space<vmem>>, vector<1x16x128xf32>,
    %c10 = arith.constant 10 : index
    %c0_54 = arith.constant 0 : index
    %c0_55 = arith.constant 0 : index
    %109 = vector.load %arg3[%c10, %c0_54, %c0_55] : memref<16x16x128xf32, #tpu.memory_space<vmem>>, vector<1x16x128xf32>
    %110 = vector.shape_cast %109 : vector<1x16x128xf32> to vector<16x128xf32>
    %111 = vector.shape_cast %54 : vector<16x128xf32> to vector<1x16x128xf32>
    tpu.vector_store %arg3[%c10, %c0_54, %c0_55], %111 {strides = array<i32>} : memref<16x16x128xf32, #tpu.memory_space<vmem>>, vector<1x16x128xf32>,
    %c11 = arith.constant 11 : index
    %c0_56 = arith.constant 0 : index
    %c0_57 = arith.constant 0 : index
    %112 = vector.load %arg3[%c11, %c0_56, %c0_57] : memref<16x16x128xf32, #tpu.memory_space<vmem>>, vector<1x16x128xf32>
    %113 = vector.shape_cast %112 : vector<1x16x128xf32> to vector<16x128xf32>
    %114 = vector.shape_cast %57 : vector<16x128xf32> to vector<1x16x128xf32>
    tpu.vector_store %arg3[%c11, %c0_56, %c0_57], %114 {strides = array<i32>} : memref<16x16x128xf32, #tpu.memory_space<vmem>>, vector<1x16x128xf32>,
    %c12 = arith.constant 12 : index
    %c0_58 = arith.constant 0 : index
    %c0_59 = arith.constant 0 : index
    %115 = vector.load %arg3[%c12, %c0_58, %c0_59] : memref<16x16x128xf32, #tpu.memory_space<vmem>>, vector<1x16x128xf32>
    %116 = vector.shape_cast %115 : vector<1x16x128xf32> to vector<16x128xf32>
    %117 = vector.shape_cast %64 : vector<16x128xf32> to vector<1x16x128xf32>
    tpu.vector_store %arg3[%c12, %c0_58, %c0_59], %117 {strides = array<i32>} : memref<16x16x128xf32, #tpu.memory_space<vmem>>, vector<1x16x128xf32>,
    %c13 = arith.constant 13 : index
    %c0_60 = arith.constant 0 : index
    %c0_61 = arith.constant 0 : index
    %118 = vector.load %arg3[%c13, %c0_60, %c0_61] : memref<16x16x128xf32, #tpu.memory_space<vmem>>, vector<1x16x128xf32>
    %119 = vector.shape_cast %118 : vector<1x16x128xf32> to vector<16x128xf32>
    %120 = vector.shape_cast %67 : vector<16x128xf32> to vector<1x16x128xf32>
    tpu.vector_store %arg3[%c13, %c0_60, %c0_61], %120 {strides = array<i32>} : memref<16x16x128xf32, #tpu.memory_space<vmem>>, vector<1x16x128xf32>,
    %c14 = arith.constant 14 : index
    %c0_62 = arith.constant 0 : index
    %c0_63 = arith.constant 0 : index
    %121 = vector.load %arg3[%c14, %c0_62, %c0_63] : memref<16x16x128xf32, #tpu.memory_space<vmem>>, vector<1x16x128xf32>
    %122 = vector.shape_cast %121 : vector<1x16x128xf32> to vector<16x128xf32>
    %123 = vector.shape_cast %70 : vector<16x128xf32> to vector<1x16x128xf32>
    tpu.vector_store %arg3[%c14, %c0_62, %c0_63], %123 {strides = array<i32>} : memref<16x16x128xf32, #tpu.memory_space<vmem>>, vector<1x16x128xf32>,
    %c15 = arith.constant 15 : index
    %c0_64 = arith.constant 0 : index
    %c0_65 = arith.constant 0 : index
    %124 = vector.load %arg3[%c15, %c0_64, %c0_65] : memref<16x16x128xf32, #tpu.memory_space<vmem>>, vector<1x16x128xf32>
    %125 = vector.shape_cast %124 : vector<1x16x128xf32> to vector<16x128xf32>
    %126 = vector.shape_cast %78 : vector<16x128xf32> to vector<1x16x128xf32>
    tpu.vector_store %arg3[%c15, %c0_64, %c0_65], %126 {strides = array<i32>} : memref<16x16x128xf32, #tpu.memory_space<vmem>>, vector<1x16x128xf32>,
    return
  }
  func.func @transform_0(%arg0: i32) -> i32 {
    %c0_i32 = arith.constant 0 : i32
    %c0_i32_0 = arith.constant 0 : i32
    return %c0_i32 : i32
  }
  func.func @transform_1(%arg0: i32) -> (i32, i32, i32) {
    %c0_i32 = arith.constant 0 : i32
    %c0_i32_0 = arith.constant 0 : i32
    %c0_i32_1 = arith.constant 0 : i32
    return %c0_i32, %arg0, %c0_i32_0 : i32, i32, i32
  }
  func.func @transform_2(%arg0: i32) -> (i32, i32, i32) {
    %c0_i32 = arith.constant 0 : i32
    %c0_i32_0 = arith.constant 0 : i32
    %c0_i32_1 = arith.constant 0 : i32
    return %c0_i32, %arg0, %c0_i32_0 : i32, i32, i32
  }
}

</mosaic_0001>

<bundles_post_ra>
// kernel: _sh_encode_flat.1
= control target key start
LH: loop header
LB: loop body
LE: loop exit
PB: predicated region body
PF: predicated region fallthrough
CT: control target
= control target key end

     0   :  { %v198_v0 = vmov 0.2820948   ;;  %s411_s2 = inlined_call_operand.vmem [shape: f32[16,16,128], index: 2, kind: output, shape index: {}]   ;;  %s412_s0 = inlined_call_operand.<no memory space> [shape: f32[1], index: 0, kind: input, shape index: {}]   ;;  %s413_s1 = inlined_call_operand.vmem [shape: f32[3,16,128], index: 1, kind: input, shape index: {}]  }
   0x1   :  { %108 = vst [vmem:[%s411_s2] sm:$0xff] %v198_v0  ;;  %v15_v1 = vstv %s412_s0  ;;  %v159_v2 = vld [vmem:[%s413_s1 + $0x10] sm:$0xff]  ;;  %v160_v3 = vld [vmem:[%s413_s1 + $0x18] sm:$0xff] }
   0x2   :  { %109 = vst [vmem:[%s411_s2 + $0x8] sm:$0xff] %v198_v0  ;;  %v229_v4 = vmul.f32 %v159_v2, %v15_v1  ;;  %v231_v5 = vmul.f32 %v160_v3, %v15_v1  ;;  %v161_v6 = vld [vmem:[%s413_s1 + $0x20] sm:$0xff]  ;;  %v162_v7 = vld [vmem:[%s413_s1 + $0x28] sm:$0xff] }
   0x3   :  { %v13_v8 = vld [vmem:[%s413_s1] sm:$0xff]  ;;  %v242_v9 = vmul.f32 %v161_v6, %v15_v1  ;;  %v244_v10 = vmul.f32 %v162_v7, %v15_v1  ;;  %v14_v12 = vld [vmem:[%s413_s1 + $0x8] sm:$0xff] }
   0x4   :  { %v246_v11 = vmul.f32 %v15_v1, %v13_v8  ;;  %v28_v13 = vmul.f32 -0.48860252, %v229_v4  ;;  %v29_v14 = vmul.f32 -0.48860252, %v231_v5  ;;  %v253_v15 = vmul.f32 %v15_v1, %v14_v12 }
   0x5   :  { %v30_v16 = vmul.f32 0.48860252, %v242_v9  ;;  %v31_v17 = vmul.f32 0.48860252, %v244_v10  ;;  %v36_v21 = vmul.f32 %v242_v9, %v229_v4  ;;  %v37_v22 = vmul.f32 %v244_v10, %v231_v5 }
   0x6   :  { %v32_v18 = vmul.f32 -0.48860252, %v246_v11  ;;  %167 = vst [vmem:[%s411_s2 + $0x10] sm:$0xff] %v28_v13  ;;  %v34_v19 = vmul.f32 %v229_v4, %v246_v11  ;;  %v35_v20 = vmul.f32 %v231_v5, %v253_v15  ;;  %v33_v23 = vmul.f32 -0.48860252, %v253_v15 }
   0x7   :  { %168 = vst [vmem:[%s411_s2 + $0x18] sm:$0xff] %v29_v14  ;;  %v44_v24 = vmul.f32 %v242_v9, %v242_v9  ;;  %v38_v25 = vmul.f32 %v242_v9, %v246_v11  ;;  %v45_v28 = vmul.f32 %v244_v10, %v244_v10  ;;  %v284_v29 = vmul.f32 %v246_v11, %v246_v11 }
   0x8   :  { %169 = vst [vmem:[%s411_s2 + $0x20] sm:$0xff] %v30_v16  ;;  %v46_v26 = vmul.f32 1.0925485, %v34_v19  ;;  %v47_v27 = vmul.f32 1.0925485, %v35_v20  ;;  %v291_v32 = vmul.f32 %v253_v15, %v253_v15  ;;  %v298_v35 = vmul.f32 %v229_v4, %v229_v4 }
   0x9   :  { %170 = vst [vmem:[%s411_s2 + $0x28] sm:$0xff] %v31_v17  ;;  %v48_v30 = vmul.f32 -1.0925485, %v36_v21  ;;  %v50_v31 = vmul.f32 0.9461747, %v44_v24  ;;  %v70_v36 = vmul.f32 -3.0, %v284_v29  ;;  %v39_v39 = vmul.f32 %v244_v10, %v253_v15 }
   0xa   :  { %171 = vst [vmem:[%s411_s2 + $0x30] sm:$0xff] %v32_v18  ;;  %v49_v33 = vmul.f32 -1.0925485, %v37_v22  ;;  %v51_v34 = vmul.f32 0.9461747, %v45_v28  ;;  %v71_v40 = vmul.f32 -3.0, %v291_v32  ;;  %v313_v43 = vmul.f32 %v231_v5, %v231_v5 }
   0xb   :  { %172 = vst [vmem:[%s411_s2 + $0x38] sm:$0xff] %v33_v23  ;;  %v163_v37 = vadd.f32 -0.31539157, %v50_v31  ;;  %v54_v38 = vmul.f32 -1.0925485, %v38_v25  ;;  %v72_v48 = vadd.f32 %v70_v36, %v298_v35  ;;  %v62_v49 = vmul.f32 5.0, %v44_v24 }
   0xc   :  { %173 = vst [vmem:[%s411_s2 + $0x40] sm:$0xff] %v46_v26  ;;  %v164_v41 = vadd.f32 -0.31539157, %v51_v34  ;;  %v56_v42 = vmul.f32 0.54627424, %v284_v29  ;;  %v73_v52 = vadd.f32 %v71_v40, %v313_v43  ;;  %v63_v53 = vmul.f32 5.0, %v45_v28 }
   0xd   :  { %174 = vst [vmem:[%s411_s2 + $0x48] sm:$0xff] %v47_v27  ;;  %v58_v44 = vmul.f32 0.54627424, %v298_v35  ;;  %v57_v45 = vmul.f32 0.54627424, %v291_v32  ;;  %v64_v59 = vsub.f32 1.0, %v62_v49  ;;  %v67_v22 = vsub.f32 %v291_v32, %v313_v43 }
   0xe   :  { %175 = vst [vmem:[%s411_s2 + $0x50] sm:$0xff] %v48_v30  ;;  %v59_v46 = vmul.f32 0.54627424, %v313_v43  ;;  %v68_v47 = vmul.f32 0.5900436, %v229_v4  ;;  %v65_v62 = vsub.f32 1.0, %v63_v53 }
   0xf   :  { %176 = vst [vmem:[%s411_s2 + $0x58] sm:$0xff] %v49_v33  ;;  %v55_v50 = vmul.f32 -1.0925485, %v39_v39  ;;  %v69_v51 = vmul.f32 0.5900436, %v231_v5  ;;  %v60_v54 = vsub.f32 %v56_v42, %v58_v44  ;;  %v165_v2 = vadd.f32 -3.0, %v62_v49 }
  0x10   :  { %177 = vst [vmem:[%s411_s2 + $0x60] sm:$0xff] %v163_v37  ;;  %v76_v55 = vmul.f32 2.8906114, %v34_v19  ;;  %v61_v56 = vsub.f32 %v57_v45, %v59_v46  ;;  %v77_v57 = vmul.f32 2.8906114, %v35_v20  ;;  %v74_v58 = vmul.f32 %v72_v48, %v68_v47 }
  0x11   :  { %178 = vst [vmem:[%s411_s2 + $0x68] sm:$0xff] %v164_v41  ;;  %v80_v60 = vmul.f32 0.4570458, %v229_v4  ;;  %v75_v61 = vmul.f32 %v73_v52, %v69_v51  ;;  %v81_v63 = vmul.f32 0.4570458, %v231_v5  ;;  %v166_v6 = vadd.f32 -3.0, %v63_v53 }
  0x12   :  { %179 = vst [vmem:[%s411_s2 + $0x70] sm:$0xff] %v54_v38  ;;  %v78_v0 = vmul.f32 %v76_v55, %v242_v9  ;;  %v84_v1 = vmul.f32 0.37317634, %v242_v9  ;;  %v79_v3 = vmul.f32 %v77_v57, %v244_v10  ;;  %v85_v4 = vmul.f32 0.37317634, %v244_v10 }
  0x13   :  { %180 = vst [vmem:[%s411_s2 + $0x78] sm:$0xff] %v55_v50  ;;  %v82_v5 = vmul.f32 %v80_v60, %v64_v59  ;;  %v90_v7 = vmul.f32 0.4570458, %v246_v11  ;;  %v100_v8 = vsub.f32 0.0, %v284_v29  ;;  %v102_v12 = vmul.f32 3.0, %v298_v35 }
  0x14   :  { %181 = vst [vmem:[%s411_s2 + $0x80] sm:$0xff] %v60_v54  ;;  %v83_v13 = vmul.f32 %v81_v63, %v65_v62  ;;  %v91_v14 = vmul.f32 0.4570458, %v253_v15  ;;  %v101_v16 = vsub.f32 0.0, %v291_v32  ;;  %v103_v17 = vmul.f32 3.0, %v313_v43 }
  0x15   :  { %182 = vst [vmem:[%s411_s2 + $0x88] sm:$0xff] %v61_v56  ;;  %v88_v18 = vmul.f32 %v165_v2, %v84_v1  ;;  %v66_v19 = vsub.f32 %v284_v29, %v298_v35  ;;  %v94_v20 = vmul.f32 1.4453057, %v242_v9  ;;  %v89_v21 = vmul.f32 %v166_v6, %v85_v4 }
  0x16   :  { %183 = vst [vmem:[%s411_s2 + $0x90] sm:$0xff] %v74_v58  ;;  %v95_v23 = vmul.f32 1.4453057, %v244_v10  ;;  %v92_v24 = vmul.f32 %v90_v7, %v64_v59  ;;  %v98_v25 = vmul.f32 0.5900436, %v246_v11  ;;  %v104_v26 = vadd.f32 %v102_v12, %v100_v8 }
  0x17   :  { %184 = vst [vmem:[%s411_s2 + $0x98] sm:$0xff] %v75_v61  ;;  %v93_v9 = vmul.f32 %v91_v14, %v65_v62  ;;  %v99_v27 = vmul.f32 0.5900436, %v253_v15  ;;  %v105_v28 = vadd.f32 %v103_v17, %v101_v16  ;;  %v96_v10 = vmul.f32 %v94_v20, %v66_v19 }
  0x18   :  { %185 = vst [vmem:[%s411_s2 + $0xa0] sm:$0xff] %v78_v0  ;;  %v97_v29 = vmul.f32 %v95_v23, %v67_v22  ;;  %v106_v11 = vmul.f32 %v104_v26, %v98_v25 }
  0x19   :  { %186 = vst [vmem:[%s411_s2 + $0xa8] sm:$0xff] %v79_v3  ;;  %v107_v15 = vmul.f32 %v105_v28, %v99_v27 }
  0x1a   :  { %187 = vst [vmem:[%s411_s2 + $0xb0] sm:$0xff] %v82_v5 }
  0x1b   :  { %188 = vst [vmem:[%s411_s2 + $0xb8] sm:$0xff] %v83_v13 }
  0x1c   :  { %189 = vst [vmem:[%s411_s2 + $0xc0] sm:$0xff] %v88_v18 }
  0x1d   :  { %190 = vst [vmem:[%s411_s2 + $0xc8] sm:$0xff] %v89_v21 }
  0x1e   :  { %191 = vst [vmem:[%s411_s2 + $0xd0] sm:$0xff] %v92_v24 }
  0x1f   :  { %192 = vst [vmem:[%s411_s2 + $0xd8] sm:$0xff] %v93_v9 }
  0x20   :  { %193 = vst [vmem:[%s411_s2 + $0xe0] sm:$0xff] %v96_v10 }
  0x21   :  { %194 = vst [vmem:[%s411_s2 + $0xe8] sm:$0xff] %v97_v29 }
  0x22   :  { %195 = vst [vmem:[%s411_s2 + $0xf0] sm:$0xff] %v106_v11 }
  0x23   :  { %196 = vst [vmem:[%s411_s2 + $0xf8] sm:$0xff] %v107_v15 }

</bundles_post_ra>
